<compile_context>
chip_gen: v7x
topology: tpu7x:2x2x1
jax: 0.10.0
libtpu: 0.0.40
codegen_flags: <defaults>
</compile_context>

<pallas_src>
import functools
import math

import jax
import jax.numpy as jnp
from jax.experimental import pallas as pl
from jax.experimental.pallas import tpu as pltpu

BN_EPS = 1e-5


def gc_layer_kernel(*refs, batch, add_residual, matmul_dtype):
    """One GraphConvolution + BatchNorm1d(training) + tanh (+ residual) layer.

    Grid: one "parallel" axis over output-feature chunks of size tf.

    refs (per grid step):
      y_ref:   (batch*node_n, F)   layer input, full feature dim (resident)
      w_ref:   (F, tf)             weight chunk
      att_ref: (node_n, node_n)    graph attention (resident)
      b_ref:   (1, tf)             graph-conv bias chunk
      g_ref:   (node_n, tf)        BN gamma chunk
      be_ref:  (node_n, tf)        BN beta chunk
      res_ref: (batch*node_n, tf)  residual chunk (second layer only)
      o_ref:   (batch*node_n, tf)  output chunk
    """
    if add_residual:
        y_ref, w_ref, att_ref, b_ref, g_ref, be_ref, res_ref, o_ref = refs
    else:
        y_ref, w_ref, att_ref, b_ref, g_ref, be_ref, o_ref = refs
        res_ref = None

    rows = y_ref.shape[0]
    node_n = rows // batch
    inv_b = 1.0 / float(batch)

    # support = Y @ W[:, chunk]  -- one MXU dot covering the whole batch.
    support = jnp.dot(
        y_ref[...].astype(matmul_dtype),
        w_ref[...].astype(matmul_dtype),
        preferred_element_type=jnp.float32,
    )
    att = att_ref[...].astype(matmul_dtype)
    bias = b_ref[...].astype(jnp.float32)

    # att applied per batch block (no block-diagonal att), fused with a
    # single-pass computation of the BN batch statistics.
    # TODO(synk): for large batch, replace this static unroll by a fori_loop /
    # (B, N, F)-reshaped reduction to bound code size and vreg live ranges.
    z_blocks = []
    z_sum = None
    zsq_sum = None
    for b in range(batch):
        sup_b = support[b * node_n:(b + 1) * node_n, :].astype(matmul_dtype)
        z_b = jnp.dot(att, sup_b, preferred_element_type=jnp.float32) + bias
        z_blocks.append(z_b)
        z_sum = z_b if z_sum is None else z_sum + z_b
        zsq_sum = z_b * z_b if zsq_sum is None else zsq_sum + z_b * z_b

    # BatchNorm1d(node_n * F), training mode: biased batch statistics per
    # (node, feature) scalar.  Feature chunking is exact because the reduction
    # is over the batch only.
    mean = z_sum * inv_b
    var = zsq_sum * inv_b - mean * mean
    inv_std = jax.lax.rsqrt(var + BN_EPS)
    scale = inv_std * g_ref[...].astype(jnp.float32)          # (node_n, tf)
    shift = be_ref[...].astype(jnp.float32) - mean * scale    # (node_n, tf)

    for b in range(batch):
        out_b = jnp.tanh(z_blocks[b] * scale + shift)
        if res_ref is not None:
            out_b = out_b + res_ref[b * node_n:(b + 1) * node_n, :].astype(jnp.float32)
        o_ref[b * node_n:(b + 1) * node_n, :] = out_b.astype(o_ref.dtype)


def _gc_layer(y2d, w, att, bias, gamma, beta, residual2d, *, batch, node_n,
              matmul_dtype, feat_chunk=128):
    rows, f = y2d.shape
    tf = f if (f <= feat_chunk or f % feat_chunk != 0) else feat_chunk
    grid = (f // tf,)

    in_specs = [
        pl.BlockSpec((rows, f), lambda j: (0, 0)),          # y (full F, resident)
        pl.BlockSpec((f, tf), lambda j: (0, j)),            # W chunk
        pl.BlockSpec((node_n, node_n), lambda j: (0, 0)),   # att (resident)
        pl.BlockSpec((1, tf), lambda j: (0, j)),            # bias chunk
        pl.BlockSpec((node_n, tf), lambda j: (0, j)),       # gamma chunk
        pl.BlockSpec((node_n, tf), lambda j: (0, j)),       # beta chunk
    ]
    args = [y2d,
            w.astype(matmul_dtype),        # halve W/att DMA on the bf16 path
            att.astype(matmul_dtype),
            bias.reshape(1, f), gamma, beta]
    if residual2d is not None:
        in_specs.append(pl.BlockSpec((rows, tf), lambda j: (0, j)))
        args.append(residual2d)

    kernel = functools.partial(
        gc_layer_kernel, batch=batch, add_residual=residual2d is not None,
        matmul_dtype=matmul_dtype)

    return pl.pallas_call(
        kernel,
        grid=grid,
        in_specs=in_specs,
        out_specs=pl.BlockSpec((rows, tf), lambda j: (0, j)),
        out_shape=jax.ShapeDtypeStruct((rows, f), y2d.dtype),
        compiler_params=pltpu.CompilerParams(
            dimension_semantics=("parallel",)),
    )(*args)


def gc_block_forward(x, params, *, matmul_dtype=jnp.float32):
    """x: (B, node_n, F); params as produced by init_params."""
    (w1, att1, b1, g1, be1, w2, att2, b2, g2, be2) = params
    batch, node_n, f = x.shape
    x2d = x.reshape(batch * node_n, f)     # free row-major view

    y = _gc_layer(x2d, w1, att1, b1, g1, be1, None,
                  batch=batch, node_n=node_n, matmul_dtype=matmul_dtype)
    out2d = _gc_layer(y, w2, att2, b2, g2, be2, x2d,
                      batch=batch, node_n=node_n, matmul_dtype=matmul_dtype)
    return out2d.reshape(batch, node_n, f)


def gc_block_reference(x, params, matmul_dtype=jnp.float32):
    """Pure-JAX reference mirroring the PyTorch forward (training-mode BN).

    Matmul operands are cast to `matmul_dtype` (f32 accumulation) exactly like
    the kernel so the bf16 path can be compared tightly too.
    """
    (w1, att1, b1, g1, be1, w2, att2, b2, g2, be2) = params
    prec = jax.lax.Precision.HIGHEST

    def gc(y, w, att, bias):
        s = jnp.einsum('bnf,fg->bng', y.astype(matmul_dtype), w.astype(matmul_dtype),
                       preferred_element_type=jnp.float32, precision=prec)
        z = jnp.einsum('nm,bmf->bnf', att.astype(matmul_dtype), s.astype(matmul_dtype),
                       preferred_element_type=jnp.float32, precision=prec)
        return z + bias.reshape(1, 1, -1).astype(jnp.float32)

    def bn(y, gamma, beta):
        mean = jnp.mean(y, axis=0, keepdims=True)
        var = jnp.mean((y - mean) ** 2, axis=0, keepdims=True)
        return (y - mean) * jax.lax.rsqrt(var + BN_EPS) * gamma[None] + beta[None]

    y = jnp.tanh(bn(gc(x, w1, att1, b1), g1, be1))
    y = jnp.tanh(bn(gc(y, w2, att2, b2), g2, be2))
    return (y + x).astype(x.dtype)


def init_params(key, in_features, node_n):
    """Matches GraphConvolution.reset_parameters; BN affine made non-trivial
    (instead of PyTorch's default gamma=1/beta=0) so a wrong (node_n, F) layout
    of the BN parameters would actually be caught by the test."""
    stdv = 1.0 / math.sqrt(in_features)
    ks = jax.random.split(key, 10)

    def uni(k, shape):
        return jax.random.uniform(k, shape, jnp.float32, minval=-stdv, maxval=stdv)

    w1 = uni(ks[0], (in_features, in_features))
    att1 = uni(ks[1], (node_n, node_n))
    b1 = uni(ks[2], (in_features,))
    w2 = uni(ks[3], (in_features, in_features))
    att2 = uni(ks[4], (node_n, node_n))
    b2 = uni(ks[5], (in_features,))

    # BatchNorm1d(node_n * in_features) affine params, row-major view as (N, F).
    g1 = 1.0 + 0.1 * jax.random.normal(ks[6], (node_n, in_features), jnp.float32)
    be1 = 0.1 * jax.random.normal(ks[7], (node_n, in_features), jnp.float32)
    g2 = 1.0 + 0.1 * jax.random.normal(ks[8], (node_n, in_features), jnp.float32)
    be2 = 0.1 * jax.random.normal(ks[9], (node_n, in_features), jnp.float32)

    return (w1, att1, b1, g1, be1, w2, att2, b2, g2, be2)


def _run_and_check(batch, node_n, in_features, matmul_dtype, atol, rtol):
    key = jax.random.PRNGKey(0)
    k_x, k_p = jax.random.split(key)
    x = jax.random.normal(k_x, (batch, node_n, in_features), jnp.float32)
    params = init_params(k_p, in_features, node_n)

    out = jax.block_until_ready(
        gc_block_forward(x, params, matmul_dtype=matmul_dtype))
    ref = gc_block_reference(x, params, matmul_dtype=matmul_dtype)

    assert out.shape == x.shape and out.dtype == x.dtype
    err = float(jnp.max(jnp.abs(out - ref)))
    assert jnp.allclose(out, ref, atol=atol, rtol=rtol), f"max abs err = {err}"


if __name__ == "__main__":
    # Small demo shape (module default node_n=48), single feature chunk.
    _run_and_check(batch=2, node_n=48, in_features=16,
                   matmul_dtype=jnp.float32, atol=5e-3, rtol=5e-3)
    # bf16 MXU operands (recommended fast path on v5e/v6e/v7x), f32 accumulation.
    _run_and_check(batch=4, node_n=48, in_features=16,
                   matmul_dtype=jnp.bfloat16, atol=5e-3, rtol=5e-3)
    # Larger feature dim: exercises the parallel feature-chunk grid (grid=(2,)).
    _run_and_check(batch=4, node_n=48, in_features=256,
                   matmul_dtype=jnp.float32, atol=5e-3, rtol=5e-3)
    print("KERNEL_OK")
</pallas_src>

<mosaic_0001>
module attributes {stable_mosaic.version = 11 : i64} {
  func.func @gc_layer_kernel(%arg0: i32, %arg1: memref<96x16xf32, #tpu.memory_space<vmem>>, %arg2: memref<16x16xf32, #tpu.memory_space<vmem>>, %arg3: memref<48x48xf32, #tpu.memory_space<vmem>>, %arg4: memref<1x16xf32, #tpu.memory_space<vmem>>, %arg5: memref<48x16xf32, #tpu.memory_space<vmem>>, %arg6: memref<48x16xf32, #tpu.memory_space<vmem>>, %arg7: memref<96x16xf32, #tpu.memory_space<vmem>>) attributes {dimension_semantics = [#tpu.dimension_semantics<parallel>], iteration_bounds = array<i64: 1>, scalar_prefetch = 0 : i64, scratch_operands = 0 : i64, tpu.core_type = #tpu.core_type<tc>, window_params = [{pipeline_mode = #tpu.pipeline_mode<synchronous>, transform_indices = @transform_0, window_bounds = array<i64: 96, 16>}, {transform_indices = @transform_1, window_bounds = array<i64: 16, 16>}, {pipeline_mode = #tpu.pipeline_mode<synchronous>, transform_indices = @transform_2, window_bounds = array<i64: 48, 48>}, {transform_indices = @transform_3, window_bounds = array<i64: 1, 16>}, {transform_indices = @transform_4, window_bounds = array<i64: 48, 16>}, {transform_indices = @transform_5, window_bounds = array<i64: 48, 16>}, {transform_indices = @transform_6, window_bounds = array<i64: 96, 16>}]} {
    %c0 = arith.constant 0 : index
    %c0_0 = arith.constant 0 : index
    %0 = vector.load %arg1[%c0, %c0_0] : memref<96x16xf32, #tpu.memory_space<vmem>>, vector<96x16xf32>
    %c0_1 = arith.constant 0 : index
    %c0_2 = arith.constant 0 : index
    %1 = vector.load %arg2[%c0_1, %c0_2] : memref<16x16xf32, #tpu.memory_space<vmem>>, vector<16x16xf32>
    %cst = arith.constant dense<0.000000e+00> : vector<96x16xf32>
    %2 = tpu.matmul %0, %1, %cst {dimension_numbers = #tpu.dot_dimension_numbers<[1], [0], [0], [1], [0, 0, 1, 1], [], []>} : vector<96x16xf32>, vector<16x16xf32>, vector<96x16xf32> -> vector<96x16xf32>
    %c0_3 = arith.constant 0 : index
    %c0_4 = arith.constant 0 : index
    %3 = vector.load %arg3[%c0_3, %c0_4] : memref<48x48xf32, #tpu.memory_space<vmem>>, vector<48x48xf32>
    %c0_5 = arith.constant 0 : index
    %c0_6 = arith.constant 0 : index
    %4 = vector.load %arg4[%c0_5, %c0_6] : memref<1x16xf32, #tpu.memory_space<vmem>>, vector<1x16xf32>
    %5 = vector.extract_strided_slice %2 {offsets = [0, 0], sizes = [48, 16], strides = [1, 1]} : vector<96x16xf32> to vector<48x16xf32>
    %cst_7 = arith.constant dense<0.000000e+00> : vector<48x16xf32>
    %6 = tpu.matmul %3, %5, %cst_7 {dimension_numbers = #tpu.dot_dimension_numbers<[1], [0], [0], [1], [0, 0, 1, 1], [], []>} : vector<48x48xf32>, vector<48x16xf32>, vector<48x16xf32> -> vector<48x16xf32>
    %7 = vector.broadcast %4 : vector<1x16xf32> to vector<48x16xf32>
    %8 = arith.addf %6, %7 : vector<48x16xf32>
    %9 = arith.mulf %8, %8 : vector<48x16xf32>
    %10 = vector.extract_strided_slice %2 {offsets = [48, 0], sizes = [48, 16], strides = [1, 1]} : vector<96x16xf32> to vector<48x16xf32>
    %cst_8 = arith.constant dense<0.000000e+00> : vector<48x16xf32>
    %11 = tpu.matmul %3, %10, %cst_8 {dimension_numbers = #tpu.dot_dimension_numbers<[1], [0], [0], [1], [0, 0, 1, 1], [], []>} : vector<48x48xf32>, vector<48x16xf32>, vector<48x16xf32> -> vector<48x16xf32>
    %12 = vector.broadcast %4 : vector<1x16xf32> to vector<48x16xf32>
    %13 = arith.addf %11, %12 : vector<48x16xf32>
    %14 = arith.addf %8, %13 : vector<48x16xf32>
    %15 = arith.mulf %13, %13 : vector<48x16xf32>
    %16 = arith.addf %9, %15 : vector<48x16xf32>
    %cst_9 = arith.constant 5.000000e-01 : f32
    %17 = vector.broadcast %cst_9 : f32 to vector<48x16xf32>
    %18 = arith.mulf %14, %17 : vector<48x16xf32>
    %cst_10 = arith.constant 5.000000e-01 : f32
    %19 = vector.broadcast %cst_10 : f32 to vector<48x16xf32>
    %20 = arith.mulf %16, %19 : vector<48x16xf32>
    %21 = arith.mulf %18, %18 : vector<48x16xf32>
    %22 = arith.subf %20, %21 : vector<48x16xf32>
    %cst_11 = arith.constant 9.99999974E-6 : f32
    %23 = vector.broadcast %cst_11 : f32 to vector<48x16xf32>
    %24 = arith.addf %22, %23 : vector<48x16xf32>
    %25 = math.rsqrt %24 : vector<48x16xf32>
    %c0_12 = arith.constant 0 : index
    %c0_13 = arith.constant 0 : index
    %26 = vector.load %arg5[%c0_12, %c0_13] : memref<48x16xf32, #tpu.memory_space<vmem>>, vector<48x16xf32>
    %27 = arith.mulf %25, %26 : vector<48x16xf32>
    %c0_14 = arith.constant 0 : index
    %c0_15 = arith.constant 0 : index
    %28 = vector.load %arg6[%c0_14, %c0_15] : memref<48x16xf32, #tpu.memory_space<vmem>>, vector<48x16xf32>
    %29 = arith.mulf %18, %27 : vector<48x16xf32>
    %30 = arith.subf %28, %29 : vector<48x16xf32>
    %31 = arith.mulf %8, %27 : vector<48x16xf32>
    %32 = arith.addf %31, %30 : vector<48x16xf32>
    %33 = math.tanh %32 : vector<48x16xf32>
    %c0_16 = arith.constant 0 : index
    %c0_17 = arith.constant 0 : index
    %34 = vector.load %arg7[%c0_16, %c0_17] : memref<96x16xf32, #tpu.memory_space<vmem>>, vector<48x16xf32>
    tpu.vector_store %arg7[%c0_16, %c0_17], %33 {strides = array<i32>} : memref<96x16xf32, #tpu.memory_space<vmem>>, vector<48x16xf32>,
    %35 = arith.mulf %13, %27 : vector<48x16xf32>
    %36 = arith.addf %35, %30 : vector<48x16xf32>
    %37 = math.tanh %36 : vector<48x16xf32>
    %c48 = arith.constant 48 : index
    %c0_18 = arith.constant 0 : index
    %38 = vector.load %arg7[%c48, %c0_18] : memref<96x16xf32, #tpu.memory_space<vmem>>, vector<48x16xf32>
    tpu.vector_store %arg7[%c48, %c0_18], %37 {strides = array<i32>} : memref<96x16xf32, #tpu.memory_space<vmem>>, vector<48x16xf32>,
    return
  }
  func.func @transform_0(%arg0: i32) -> (i32, i32) {
    %c0_i32 = arith.constant 0 : i32
    %c0_i32_0 = arith.constant 0 : i32
    %c0_i32_1 = arith.constant 0 : i32
    return %c0_i32, %c0_i32_0 : i32, i32
  }
  func.func @transform_1(%arg0: i32) -> (i32, i32) {
    %c0_i32 = arith.constant 0 : i32
    %c0_i32_0 = arith.constant 0 : i32
    return %c0_i32, %arg0 : i32, i32
  }
  func.func @transform_2(%arg0: i32) -> (i32, i32) {
    %c0_i32 = arith.constant 0 : i32
    %c0_i32_0 = arith.constant 0 : i32
    %c0_i32_1 = arith.constant 0 : i32
    return %c0_i32, %c0_i32_0 : i32, i32
  }
  func.func @transform_3(%arg0: i32) -> (i32, i32) {
    %c0_i32 = arith.constant 0 : i32
    %c0_i32_0 = arith.constant 0 : i32
    return %c0_i32, %arg0 : i32, i32
  }
  func.func @transform_4(%arg0: i32) -> (i32, i32) {
    %c0_i32 = arith.constant 0 : i32
    %c0_i32_0 = arith.constant 0 : i32
    return %c0_i32, %arg0 : i32, i32
  }
  func.func @transform_5(%arg0: i32) -> (i32, i32) {
    %c0_i32 = arith.constant 0 : i32
    %c0_i32_0 = arith.constant 0 : i32
    return %c0_i32, %arg0 : i32, i32
  }
  func.func @transform_6(%arg0: i32) -> (i32, i32) {
    %c0_i32 = arith.constant 0 : i32
    %c0_i32_0 = arith.constant 0 : i32
    return %c0_i32, %arg0 : i32, i32
  }
}

</mosaic_0001>

<bundles_post_ra>
// kernel: tpu_custom_call.1
= control target key start
LH: loop header
LB: loop body
LE: loop exit
PB: predicated region body
PF: predicated region fallthrough
CT: control target
= control target key end

     0   :  { %vm37_vm0 = vcmask 130048   ;;  %vm212_vm1 = vcmask 392192   ;;  %s1068_s1 = inlined_call_operand.vmem [shape: f32[16,16], index: 1, kind: input, shape index: {}]   ;;  %s1069_s0 = inlined_call_operand.vmem [shape: f32[96,16], index: 0, kind: input, shape index: {}]   ;;  %s1070_s2 = inlined_call_operand.vmem [shape: f32[48,48], index: 2, kind: input, shape index: {}]   ;;  %s1071_s3 = inlined_call_operand.vmem [shape: f32[1,16], index: 3, kind: input, shape index: {}]   ;;  %s1072_s4 = inlined_call_operand.vmem [shape: f32[48,16], index: 4, kind: input, shape index: {}]   ;;  %s1073_s5 = inlined_call_operand.vmem [shape: f32[48,16], index: 5, kind: input, shape index: {}]   ;;  %s1074_s6 = inlined_call_operand.vmem [shape: f32[96,16], index: 6, kind: output, shape index: {}]  }
   0x1   :  { %v35_v0 = vld [vmem:[%s1068_s1] sm:$0xff]  ;;  %v36_v1 = vld [vmem:[%s1068_s1 + $0x8] sm:$0xff]  ;;  %v25_v5 = vld [vmem:[%s1069_s0 + $0x10] sm:$0xff] }
   0x2   :  { %v23_v2 = vld [vmem:[%s1069_s0] sm:$0xff]  ;;  %v690_v3 = vpack.c.bf16 %v36_v1, %v35_v0  ;;  %v24_v4 = vld [vmem:[%s1069_s0 + $0x8] sm:$0xff]  ;;  %v26_v6 = vld [vmem:[%s1069_s0 + $0x18] sm:$0xff] }
   0x3   :  { %630 = vmatprep.mubr.msk.f32.mxu0 %vm37_vm0, %v23_v2  ;;  %v27_v7 = vld [vmem:[%s1069_s0 + $0x20] sm:$0xff]  ;;  %v28_v8 = vld [vmem:[%s1069_s0 + $0x28] sm:$0xff]  ;;  %v29_v9 = vld [vmem:[%s1069_s0 + $0x30] sm:$0xff] }
   0x4   :  { %691 = vmatprep.subr.bf16.mxu0 %v690_v3  ;;  %v30_v10 = vld [vmem:[%s1069_s0 + $0x38] sm:$0xff]  ;;  %v31_v11 = vld [vmem:[%s1069_s0 + $0x40] sm:$0xff]  ;;  %v32_v12 = vld [vmem:[%s1069_s0 + $0x48] sm:$0xff] }
   0x5   :  { %693 = vmatpush3.bf16.msra.mxu0 %v690_v3  ;;  %v33_v13 = vld [vmem:[%s1069_s0 + $0x50] sm:$0xff]  ;;  %v34_v14 = vld [vmem:[%s1069_s0 + $0x58] sm:$0xff]  ;;  %v199_v15 = vld [vmem:[%s1070_s2] sm:$0xff] }
   0x6   :  { %660 = vmatprep.mubr.msk.f32.mxu1 %vm212_vm1, %v199_v15  ;;  %v200_v27 = vld [vmem:[%s1070_s2 + $0x8] sm:$0xff]  ;;  %v201_v29 = vld [vmem:[%s1070_s2 + $0x10] sm:$0xff]  ;;  %v202_v32 = vld [vmem:[%s1070_s2 + $0x18] sm:$0xff] }
   0x7   :  { %v203_v34 = vld [vmem:[%s1070_s2 + $0x20] sm:$0xff]  ;;  %v204_v37 = vld [vmem:[%s1070_s2 + $0x28] sm:$0xff] }
   0x8   :  { %631 = vmatmul.mubr.msk.f32.vlgmr.msra.gmra.mrb[0].mxu0 %vm37_vm0, %v24_v4  ;;  %v575_v43 = vld [vmem:[%s1071_s3] ss:$0 sm:$0xff] }
   0x9   :  { %633 = vmatprep.mubr.msk.f32.mxu0 %vm37_vm0, %v25_v5 }
   0xc   :  { %634 = vmatmul.mubr.msk.f32.gmra.mrb[2].mxu0 %vm37_vm0, %v26_v6 }
   0xd   :  { %636 = vmatprep.mubr.msk.f32.mxu0 %vm37_vm0, %v27_v7 }
  0x10   :  { %637 = vmatmul.mubr.msk.f32.gmra.mrb[4].mxu0 %vm37_vm0, %v28_v8 }
  0x11   :  { %639 = vmatprep.mubr.msk.f32.mxu0 %vm37_vm0, %v29_v9 }
  0x14   :  { %640 = vmatmul.mubr.msk.f32.gmra.mrb[6].mxu0 %vm37_vm0, %v30_v10 }
  0x15   :  { %642 = vmatprep.mubr.msk.f32.mxu0 %vm37_vm0, %v31_v11 }
  0x18   :  { %643 = vmatmul.mubr.msk.f32.gmra.mrb[8].mxu0 %vm37_vm0, %v32_v12 }
  0x19   :  { %645 = vmatprep.mubr.msk.f32.mxu0 %vm37_vm0, %v33_v13 }
  0x1c   :  { %646 = vmatmul.mubr.msk.f32.gmra.mrb[10].mxu0 %vm37_vm0, %v34_v14 }
  0x1d   :  { %681 = vmatprep.mubr.msk.f32.mxu0 %vm212_vm1, %v199_v15 }
  0xdb   :  { %v632_v16 = vpop.f32.mrb[0].mxu0 }
  0xdc   :  { %v140_v17 = vpop.f32.mrb[1].mxu0 }
  0xdd   :  { %v694_v18 = vpack.c.bf16 %v632_v16, %v140_v17 }
  0xdf   :  { %v635_v19 = vpop.f32.mrb[2].mxu0  ;;  %695 = vmatprep.subr.bf16.mxu1 %v694_v18 }
  0xe0   :  { %v150_v20 = vpop.f32.mrb[3].mxu0  ;;  %697 = vmatpush3.bf16.msra.mxu1 %v694_v18 }
  0xe1   :  { %v698_v21 = vpack.c.bf16 %v635_v19, %v150_v20 }
  0xe3   :  { %v638_v22 = vpop.f32.mrb[4].mxu0  ;;  %699 = vmatprep.subr.bf16.mxu1 %v698_v21 }
  0xe4   :  { %v160_v23 = vpop.f32.mrb[5].mxu0  ;;  %701 = vmatpush3.bf16.msra.mxu1 %v698_v21 }
  0xe5   :  { %v702_v24 = vpack.c.bf16 %v638_v22, %v160_v23 }
  0xe7   :  { %v641_v25 = vpop.f32.mrb[6].mxu0  ;;  %703 = vmatprep.subr.bf16.mxu1 %v702_v24 }
  0xe8   :  { %v170_v26 = vpop.f32.mrb[7].mxu0  ;;  %705 = vmatpush3.bf16.msra.mxu1 %v702_v24 }
  0xe9   :  { %v706_v28 = vpack.c.bf16 %v641_v25, %v170_v26 }
  0xeb   :  { %v644_v30 = vpop.f32.mrb[8].mxu0  ;;  %661 = vmatmul.mubr.msk.f32.vlgmr.msra.gmra.mrb[0].mxu1 %vm212_vm1, %v200_v27  ;;  %707 = vmatprep.subr.bf16.mxu0 %v706_v28 }
  0xec   :  { %718 = vmatprep.subr.bf16.mxu1 %v706_v28  ;;  %v180_v31 = vpop.f32.mrb[9].mxu0  ;;  %709 = vmatpush3.bf16.msra.mxu0 %v706_v28 }
  0xed   :  { %v710_v33 = vpack.c.bf16 %v644_v30, %v180_v31  ;;  %721 = vmatpush3.bf16.msra.mxu1 %v706_v28  ;;  %663 = vmatprep.mubr.msk.f32.mxu1 %vm212_vm1, %v201_v29 }
  0xef   :  { %v647_v35 = vpop.f32.mrb[10].mxu0  ;;  %664 = vmatmul.mubr.msk.f32.gmra.mrb[2].mxu1 %vm212_vm1, %v202_v32  ;;  %711 = vmatprep.subr.bf16.mxu0 %v710_v33 }
  0xf0   :  { %719 = vmatprep.subr.bf16.mxu1 %v710_v33  ;;  %v190_v36 = vpop.f32.mrb[11].mxu0  ;;  %713 = vmatpush3.bf16.msra.mxu0 %v710_v33 }
  0xf1   :  { %v714_v38 = vpack.c.bf16 %v647_v35, %v190_v36  ;;  %722 = vmatpush3.bf16.msra.mxu1 %v710_v33  ;;  %666 = vmatprep.mubr.msk.f32.mxu1 %vm212_vm1, %v203_v34 }
  0xf3   :  { %667 = vmatmul.mubr.msk.f32.gmra.mrb[4].mxu1 %vm212_vm1, %v204_v37  ;;  %715 = vmatprep.subr.bf16.mxu0 %v714_v38 }
  0xf4   :  { %720 = vmatprep.subr.bf16.mxu1 %v714_v38  ;;  %717 = vmatpush3.bf16.msra.mxu0 %v714_v38 }
  0xf5   :  { %723 = vmatpush3.bf16.msra.mxu1 %v714_v38  ;;  %684 = vmatprep.mubr.msk.f32.mxu1 %vm212_vm1, %v201_v29 }
  0xf7   :  { %682 = vmatmul.mubr.msk.f32.vlgmr.msra.gmra.mrb[12].mxu0 %vm212_vm1, %v200_v27 }
  0xf8   :  { %685 = vmatmul.mubr.msk.f32.vlgmr.msra.gmra.mrb[6].mxu1 %vm212_vm1, %v202_v32 }
  0xf9   :  { %687 = vmatprep.mubr.msk.f32.mxu1 %vm212_vm1, %v203_v34 }
  0xfc   :  { %688 = vmatmul.mubr.msk.f32.gmra.mrb[8].mxu1 %vm212_vm1, %v204_v37 }
 0x1be   :  { %v662_v39 = vpop.f32.mrb[0].mxu1 }
 0x1bf   :  { %v297_v40 = vpop.f32.mrb[1].mxu1  ;;  %v882_v45 = vadd.f32 %v662_v39, %v575_v43 }
 0x1c0   :  { %v884_v46 = vadd.f32 %v575_v43, %v297_v40 }
 0x1c1   :  { %v327_v52 = vmul.f32 %v882_v45, %v882_v45 }
 0x1c2   :  { %v665_v41 = vpop.f32.mrb[2].mxu1  ;;  %v326_v53 = vmul.f32 %v884_v46, %v884_v46 }
 0x1c3   :  { %v307_v42 = vpop.f32.mrb[3].mxu1  ;;  %v886_v47 = vadd.f32 %v665_v41, %v575_v43 }
 0x1c4   :  { %v888_v49 = vadd.f32 %v575_v43, %v307_v42 }
 0x1c5   :  { %v329_v54 = vmul.f32 %v886_v47, %v886_v47 }
 0x1c6   :  { %v668_v44 = vpop.f32.mrb[4].mxu1  ;;  %v328_v58 = vmul.f32 %v888_v49, %v888_v49 }
 0x1c7   :  { %v317_v48 = vpop.f32.mrb[5].mxu1  ;;  %v890_v50 = vadd.f32 %v668_v44, %v575_v43 }
 0x1c8   :  { %v902_v59 = vadd.f32 %v575_v43, %v317_v48 }
 0x1c9   :  { %v331_v63 = vmul.f32 %v890_v50, %v890_v50 }
 0x1ca   :  { %v683_v51 = vpop.f32.mrb[12].mxu0  ;;  %v330_v29 = vmul.f32 %v902_v59, %v902_v59 }
 0x1cb   :  { %v898_v55 = vadd.f32 %v683_v51, %v575_v43  ;;  %v686_v56 = vpop.f32.mrb[6].mxu1  ;;  %v398_v57 = vpop.f32.mrb[13].mxu0 }
 0x1cc   :  { %v904_v60 = vadd.f32 %v686_v56, %v575_v43  ;;  %v906_v61 = vadd.f32 %v575_v43, %v398_v57  ;;  %v408_v62 = vpop.f32.mrb[7].mxu1 }
 0x1cd   :  { %v428_v0 = vadd.f32 %v898_v55, %v882_v45  ;;  %v434_v1 = vmul.f32 %v898_v55, %v898_v55  ;;  %v914_v2 = vadd.f32 %v575_v43, %v408_v62 }
 0x1ce   :  { %v430_v3 = vadd.f32 %v904_v60, %v886_v47  ;;  %v436_v4 = vmul.f32 %v904_v60, %v904_v60  ;;  %v427_v5 = vadd.f32 %v906_v61, %v884_v46  ;;  %v433_v6 = vmul.f32 %v906_v61, %v906_v61 }
 0x1cf   :  { %v440_v7 = vadd.f32 %v434_v1, %v327_v52  ;;  %v924_v8 = vmul.f32 0.5, %v428_v0  ;;  %v429_v9 = vadd.f32 %v914_v2, %v888_v49  ;;  %v435_v10 = vmul.f32 %v914_v2, %v914_v2  ;;  %v689_v11 = vpop.f32.mrb[8].mxu1  ;;  %v484_v0 = vld [vmem:[%s1072_s4 + $0x18] sm:$0xff] }
 0x1d0   :  { %v442_v12 = vadd.f32 %v436_v4, %v329_v54  ;;  %v930_v13 = vmul.f32 0.5, %v430_v3  ;;  %v439_v14 = vadd.f32 %v433_v6, %v326_v53  ;;  %v932_v15 = vmul.f32 0.5, %v427_v5  ;;  %v418_v16 = vpop.f32.mrb[9].mxu1  ;;  %v481_v3 = vld [vmem:[%s1072_s4] sm:$0xff]  ;;  %v483_v6 = vld [vmem:[%s1072_s4 + $0x10] sm:$0xff] }
 0x1d1   :  { %v452_v17 = vmul.f32 0.5, %v440_v7  ;;  %v458_v18 = vmul.f32 %v924_v8, %v924_v8  ;;  %v441_v19 = vadd.f32 %v435_v10, %v328_v58  ;;  %v936_v20 = vmul.f32 0.5, %v429_v9  ;;  %v494_v9 = vld [vmem:[%s1073_s5 + $0x8] sm:$0xff] }
 0x1d2   :  { %v454_v21 = vmul.f32 0.5, %v442_v12  ;;  %v460_v22 = vmul.f32 %v930_v13, %v930_v13  ;;  %v451_v23 = vmul.f32 0.5, %v439_v14  ;;  %v457_v24 = vmul.f32 %v932_v15, %v932_v15 }
 0x1d3   :  { %v464_v25 = vsub.f32 %v452_v17, %v458_v18  ;;  %v453_v26 = vmul.f32 0.5, %v441_v19  ;;  %v459_v27 = vmul.f32 %v936_v20, %v936_v20  ;;  %v944_v28 = vadd.f32 %v689_v11, %v575_v43  ;;  %v496_v17 = vld [vmem:[%s1073_s5 + $0x18] sm:$0xff] }
 0x1d4   :  { %v466_v30 = vsub.f32 %v454_v21, %v460_v22  ;;  %v463_v31 = vsub.f32 %v451_v23, %v457_v24  ;;  %v948_v32 = vadd.f32 %v575_v43, %v418_v16  ;;  %v493_v23 = vld [vmem:[%s1073_s5] sm:$0xff] }
 0x1d5   :  { %v470_v33 = vadd.f32 1e-05, %v464_v25  ;;  %v465_v34 = vsub.f32 %v453_v26, %v459_v27  ;;  %v432_v35 = vadd.f32 %v944_v28, %v890_v50  ;;  %v438_v36 = vmul.f32 %v944_v28, %v944_v28 }
 0x1d6   :  { %v472_v37 = vadd.f32 1e-05, %v466_v30  ;;  %v469_v38 = vadd.f32 1e-05, %v463_v31  ;;  %v431_v39 = vadd.f32 %v948_v32, %v902_v59  ;;  %v437_v40 = vmul.f32 %v948_v32, %v948_v32 }
 0x1d7   :  { %724 = vrsqrt.f32 %v470_v33  ;;  %v471_v41 = vadd.f32 1e-05, %v465_v34  ;;  %v444_v42 = vadd.f32 %v438_v36, %v331_v63  ;;  %v958_v43 = vmul.f32 0.5, %v432_v35  ;;  %v482_v63 = vld [vmem:[%s1072_s4 + $0x8] sm:$0xff] }
 0x1d8   :  { %726 = vrsqrt.f32 %v472_v37  ;;  %v443_v44 = vadd.f32 %v437_v40, %v330_v29  ;;  %v960_v48 = vmul.f32 0.5, %v431_v39  ;;  %v486_v29 = vld [vmem:[%s1072_s4 + $0x28] sm:$0xff] }
 0x1d9   :  { %728 = vrsqrt.f32 %v469_v38  ;;  %v456_v51 = vmul.f32 0.5, %v444_v42  ;;  %v462_v52 = vmul.f32 %v958_v43, %v958_v43  ;;  %v498_v39 = vld [vmem:[%s1073_s5 + $0x28] sm:$0xff] }
 0x1da   :  { %730 = vrsqrt.f32 %v471_v41  ;;  %v455_v53 = vmul.f32 0.5, %v443_v44  ;;  %v461_v54 = vmul.f32 %v960_v48, %v960_v48 }
 0x1db   :  { %v468_v56 = vsub.f32 %v456_v51, %v462_v52  ;;  %v497_v51 = vld [vmem:[%s1073_s5 + $0x20] sm:$0xff] }
 0x1dc   :  { %v467_v57 = vsub.f32 %v455_v53, %v461_v54 }
 0x1dd   :  { %v474_v58 = vadd.f32 1e-05, %v468_v56 }
 0x1de   :  { %v473_v62 = vadd.f32 1e-05, %v467_v57 }
 0x1df   :  { %732 = vrsqrt.f32 %v474_v58 }
 0x1e0   :  { %734 = vrsqrt.f32 %v473_v62 }
 0x1e1   :  { %v725_v1 = vpop.eup %724 }
 0x1e2   :  { %v727_v4 = vpop.eup %726  ;;  %v488_v5 = vmul.f32 %v725_v1, %v482_v63 }
 0x1e3   :  { %v729_v7 = vpop.eup %728  ;;  %v490_v10 = vmul.f32 %v727_v4, %v484_v0 }
 0x1e4   :  { %v731_v11 = vpop.eup %730  ;;  %v500_v12 = vmul.f32 %v488_v5, %v924_v8  ;;  %v512_v14 = vmul.f32 %v488_v5, %v882_v45  ;;  %v536_v16 = vmul.f32 %v488_v5, %v898_v55  ;;  %v487_v18 = vmul.f32 %v729_v7, %v481_v3 }
 0x1e5   :  { %v502_v19 = vmul.f32 %v490_v10, %v930_v13  ;;  %v514_v21 = vmul.f32 %v490_v10, %v886_v47  ;;  %v538_v22 = vmul.f32 %v490_v10, %v904_v60  ;;  %v489_v8 = vmul.f32 %v731_v11, %v483_v6  ;;  %v495_v13 = vld [vmem:[%s1073_s5 + $0x10] sm:$0xff] }
 0x1e6   :  { %v506_v24 = vsub.f32 %v494_v9, %v500_v12  ;;  %v499_v45 = vmul.f32 %v487_v18, %v932_v15  ;;  %v511_v55 = vmul.f32 %v487_v18, %v884_v46  ;;  %v535_v25 = vmul.f32 %v487_v18, %v906_v61  ;;  %v485_v61 = vld [vmem:[%s1072_s4 + $0x20] sm:$0xff] }
 0x1e7   :  { %v508_v26 = vsub.f32 %v496_v17, %v502_v19  ;;  %v501_v47 = vmul.f32 %v489_v8, %v936_v20  ;;  %v513_v60 = vmul.f32 %v489_v8, %v888_v49  ;;  %v537_v27 = vmul.f32 %v489_v8, %v914_v2 }
 0x1e8   :  { %v518_v15 = vadd.f32 %v512_v14, %v506_v24  ;;  %v542_v30 = vadd.f32 %v536_v16, %v506_v24  ;;  %v505_v46 = vsub.f32 %v493_v23, %v499_v45 }
 0x1e9   :  { %v733_v31 = vpop.eup %732  ;;  %v520_v33 = vadd.f32 %v514_v21, %v508_v26  ;;  %v544_v34 = vadd.f32 %v538_v22, %v508_v26  ;;  %v507_v35 = vsub.f32 %v495_v13, %v501_v47 }
 0x1ea   :  { %v735_v20 = vpop.eup %734  ;;  %736 = vtanh.f32 %v518_v15  ;;  %v517_v49 = vadd.f32 %v511_v55, %v505_v46  ;;  %v541_v36 = vadd.f32 %v535_v25, %v505_v46  ;;  %v492_v2 = vmul.f32 %v733_v31, %v486_v29 }
 0x1eb   :  { %738 = vtanh.f32 %v542_v30  ;;  %v519_v37 = vadd.f32 %v513_v60, %v507_v35  ;;  %v543_v38 = vadd.f32 %v537_v27, %v507_v35  ;;  %v491_v40 = vmul.f32 %v735_v20, %v485_v61 }
 0x1ec   :  { %740 = vtanh.f32 %v520_v33  ;;  %v504_v41 = vmul.f32 %v492_v2, %v958_v43  ;;  %v516_v42 = vmul.f32 %v492_v2, %v890_v50  ;;  %v540_v44 = vmul.f32 %v492_v2, %v944_v28 }
 0x1ed   :  { %742 = vtanh.f32 %v544_v34  ;;  %v503_v52 = vmul.f32 %v491_v40, %v960_v48  ;;  %v515_v53 = vmul.f32 %v491_v40, %v902_v59  ;;  %v539_v54 = vmul.f32 %v491_v40, %v948_v32 }
 0x1ee   :  { %744 = vtanh.f32 %v517_v49  ;;  %v510_v56 = vsub.f32 %v498_v39, %v504_v41 }
 0x1ef   :  { %746 = vtanh.f32 %v541_v36  ;;  %v509_v57 = vsub.f32 %v497_v51, %v503_v52 }
 0x1f0   :  { %748 = vtanh.f32 %v519_v37  ;;  %v522_v43 = vadd.f32 %v516_v42, %v510_v56  ;;  %v546_v50 = vadd.f32 %v540_v44, %v510_v56 }
 0x1f1   :  { %750 = vtanh.f32 %v543_v38  ;;  %v521_v28 = vadd.f32 %v515_v53, %v509_v57  ;;  %v545_v58 = vadd.f32 %v539_v54, %v509_v57 }
 0x1f2   :  { %752 = vtanh.f32 %v522_v43 }
 0x1f3   :  { %754 = vtanh.f32 %v546_v50 }
 0x1f4   :  { %v737_v62 = vpop.eup %736  ;;  %756 = vtanh.f32 %v521_v28 }
 0x1f5   :  { %v739_v63 = vpop.eup %738  ;;  %530 = vst.msk [vmem:[%s1074_s6 + $0x8] sm:$0xff] %vm37_vm0, %v737_v62  ;;  %758 = vtanh.f32 %v545_v58 }
 0x1f6   :  { %v741_v59 = vpop.eup %740  ;;  %554 = vst.msk [vmem:[%s1074_s6 + $0x38] sm:$0xff] %vm37_vm0, %v739_v63 }
 0x1f7   :  { %v743_v32 = vpop.eup %742  ;;  %532 = vst.msk [vmem:[%s1074_s6 + $0x18] sm:$0xff] %vm37_vm0, %v741_v59 }
 0x1f8   :  { %v745_v48 = vpop.eup %744  ;;  %556 = vst.msk [vmem:[%s1074_s6 + $0x48] sm:$0xff] %vm37_vm0, %v743_v32 }
 0x1f9   :  { %v747_v0 = vpop.eup %746  ;;  %529 = vst.msk [vmem:[%s1074_s6] sm:$0xff] %vm37_vm0, %v745_v48 }
 0x1fa   :  { %v749_v1 = vpop.eup %748  ;;  %553 = vst.msk [vmem:[%s1074_s6 + $0x30] sm:$0xff] %vm37_vm0, %v747_v0 }
 0x1fb   :  { %v751_v3 = vpop.eup %750  ;;  %531 = vst.msk [vmem:[%s1074_s6 + $0x10] sm:$0xff] %vm37_vm0, %v749_v1 }
 0x1fc   :  { %v753_v4 = vpop.eup %752  ;;  %555 = vst.msk [vmem:[%s1074_s6 + $0x40] sm:$0xff] %vm37_vm0, %v751_v3 }
 0x1fd   :  { %v755_v5 = vpop.eup %754  ;;  %534 = vst.msk [vmem:[%s1074_s6 + $0x28] sm:$0xff] %vm37_vm0, %v753_v4 }
 0x1fe   :  { %v757_v6 = vpop.eup %756  ;;  %558 = vst.msk [vmem:[%s1074_s6 + $0x58] sm:$0xff] %vm37_vm0, %v755_v5 }
 0x1ff   :  { %v759_v7 = vpop.eup %758  ;;  %533 = vst.msk [vmem:[%s1074_s6 + $0x20] sm:$0xff] %vm37_vm0, %v757_v6 }
 0x200   :  { %557 = vst.msk [vmem:[%s1074_s6 + $0x50] sm:$0xff] %vm37_vm0, %v759_v7 }

</bundles_post_ra>
